<compile_context>
chip_gen: v7x
topology: tpu7x:2x2x1
jax: 0.10.0
libtpu: 0.0.40
codegen_flags: <defaults>
</compile_context>

<pallas_src>
import functools

import jax
import jax.numpy as jnp
from jax.experimental import pallas as pl
from jax.experimental.pallas import tpu as pltpu

LANE = 128


def _round_up(x, m):
    return ((x + m - 1) // m) * m


def _router_kernel(x_ref, w_ref, b_ref, noise_ref, out_ref, *,
                   top_k: int, e: int, e_pad: int):
    # x_ref:     (tm, D)        f32   (cast to bf16 in-kernel for the MXU)
    # w_ref:     (D, 2*e_pad)   bf16  [route | noise] along the lane axis
    # b_ref:     (1, 2*e_pad)   f32   (padded route lanes biased to -1e30)
    # noise_ref: (tm, E)        f32   (unpadded; zero-extended in-kernel)
    # out_ref:   (tm, e_pad)    bf16  probs in lanes [0,E), top-k indices packed
    #                                 into lanes [E, E+top_k), zeros elsewhere.

    # single fused MXU pass for both linears, f32 accumulation
    x_bf = x_ref[...].astype(jnp.bfloat16)
    merged = jnp.dot(x_bf, w_ref[...],
                     preferred_element_type=jnp.float32) + b_ref[...]
    logits = merged[:, :e_pad]           # router logits (padded lanes ~ -1e30)
    noise_logits = merged[:, e_pad:]     # noise logits  (padded lanes ~ 0)

    # numerically stable softplus(x) = max(x,0) + log1p(exp(-|x|))
    softplus = jnp.maximum(noise_logits, 0.0) + jnp.log1p(
        jnp.exp(-jnp.abs(noise_logits)))

    tm = x_bf.shape[0]
    # zero-extend the (tm, E) noise to the lane-dense width inside VMEM
    noise = jnp.concatenate(
        [noise_ref[...], jnp.zeros((tm, e_pad - e), jnp.float32)], axis=-1)

    noisy = logits + noise * softplus                      # (tm, e_pad)

    col = jax.lax.broadcasted_iota(jnp.int32, (tm, e_pad), 1)
    neg_inf = jnp.float32(-jnp.inf)

    # Unrolled top-k with fused online softmax: the first selected value is the
    # row max m0, so exp(v_j - m0) is accumulated directly (no dense `sparse`
    # temporary, no dense exp pass, no extra XLU max for the softmax).
    work = noisy
    p_acc = jnp.zeros((tm, e_pad), jnp.float32)
    denom = jnp.zeros((tm, 1), jnp.float32)
    m0 = None
    idx_cols = []
    for j in range(top_k):                                 # static unroll, k small
        m = jnp.max(work, axis=-1, keepdims=True)
        if j == 0:
            m0 = m
            ev = jnp.ones_like(m)                          # exp(m0 - m0)
        else:
            ev = jnp.exp(m - m0)
        is_max = work == m
        # first-occurrence index of the current maximum (matches lax.top_k ties)
        idx = jnp.min(jnp.where(is_max, col, e_pad), axis=-1, keepdims=True)
        onehot = col == idx
        p_acc = p_acc + jnp.where(onehot, ev, 0.0)
        denom = denom + ev
        work = jnp.where(onehot, neg_inf, work)
        idx_cols.append(idx)

    probs = p_acc * pl.reciprocal(denom, approx=True)      # (tm, e_pad), pads = 0

    # pack the top-k indices (exact small ints) into the unused padded lanes
    out = probs
    for j in range(top_k):
        out = jnp.where(col == e + j, idx_cols[j].astype(jnp.float32), out)
    out_ref[...] = out.astype(out_ref.dtype)


def noisy_topk_router(x, w_route, b_route, w_noise, b_noise, noise, top_k,
                      *, tm=1024):
    """x: (B, T, D). Returns (router_output (B,T,E) f32, indices (B,T,top_k) i32)."""
    B, T, D = x.shape
    E = w_route.shape[1]
    N = B * T
    assert 0 < top_k <= E, "top_k must be in (0, num_experts]"

    # expert axis padded to a lane-dense width, with room to stash the indices
    e_pad = _round_up(max(E + top_k, LANE), LANE)

    # ---- merged weights / bias (tiny, built once per call) ----
    w_merged = jnp.zeros((D, 2 * e_pad), jnp.float32)
    w_merged = w_merged.at[:, :E].set(w_route)
    w_merged = w_merged.at[:, e_pad:e_pad + E].set(w_noise)
    w_bf = w_merged.astype(jnp.bfloat16)

    b_merged = jnp.zeros((1, 2 * e_pad), jnp.float32)
    b_merged = b_merged.at[:, :E].set(b_route.reshape(1, E))
    b_merged = b_merged.at[:, E:e_pad].set(-1e30)   # padded experts never win top-k
    b_merged = b_merged.at[:, e_pad:e_pad + E].set(b_noise.reshape(1, E))

    # tokens as rows: reshape only — no pad / cast round trips in HBM
    x2 = x.reshape(N, D)
    noise2 = noise.reshape(N, E)

    # ---- row tile selection ----
    tm_eff = tm
    if N > 8:
        # guarantee >= 2 grid steps so the "parallel" axis can split across
        # v7x's two TensorCores (also keeps the tile a multiple of 8)
        tm_eff = min(tm_eff, _round_up(pl.cdiv(N, 2), 8))
    tm_eff = min(tm_eff, N)

    def _vmem_est(t):
        # double-buffered I/O blocks + generous headroom for (t, e_pad) f32 temps
        dbl = 2 * (t * D * 4 + D * 2 * e_pad * 2 + 2 * e_pad * 4
                   + t * E * 4 + t * e_pad * 2)
        tmp = 8 * t * e_pad * 4
        return dbl + tmp

    # budget per-core VMEM conservatively (v7x: 64 MiB physical, 32 MiB scoped default)
    while tm_eff > 256 and _vmem_est(tm_eff) > (48 << 20):
        tm_eff //= 2
    # raise the scoped VMEM limit explicitly (v5e default is only ~16 MiB)
    vmem_limit = min(max(int(_vmem_est(tm_eff) * 1.25) + (4 << 20), 32 << 20),
                     64 << 20)

    # cdiv grid: if N % tm_eff != 0 the last block's out-of-bounds rows read
    # garbage and their writes are dropped, so no explicit row padding is needed.
    grid = (pl.cdiv(N, tm_eff),)
    kernel = functools.partial(_router_kernel, top_k=top_k, e=E, e_pad=e_pad)

    cost = pl.CostEstimate(
        flops=2 * N * D * (2 * e_pad),
        transcendentals=2 * N * e_pad + N * top_k,   # softplus exp/log1p + top-k exps
        bytes_accessed=(N * D * 4                    # x (f32, streamed once)
                        + D * 2 * e_pad * 2          # merged weights (bf16)
                        + 2 * e_pad * 4              # merged bias
                        + N * E * 4                  # noise (unpadded f32)
                        + N * e_pad * 2))            # packed probs+idx out (bf16)

    out = pl.pallas_call(
        kernel,
        out_shape=jax.ShapeDtypeStruct((N, e_pad), jnp.bfloat16),
        grid_spec=pltpu.PrefetchScalarGridSpec(
            num_scalar_prefetch=0,
            grid=grid,
            in_specs=[
                pl.BlockSpec((tm_eff, D), lambda i: (i, 0)),          # x rows (f32)
                pl.BlockSpec((D, 2 * e_pad), lambda i: (0, 0)),       # merged weights
                pl.BlockSpec((1, 2 * e_pad), lambda i: (0, 0)),       # merged bias
                pl.BlockSpec((tm_eff, E), lambda i: (i, 0)),          # noise (unpadded)
            ],
            out_specs=pl.BlockSpec((tm_eff, e_pad), lambda i: (i, 0)),  # lane-dense
        ),
        compiler_params=pltpu.CompilerParams(
            dimension_semantics=("parallel",),
            vmem_limit_bytes=vmem_limit),
        cost_estimate=cost,
    )(x2, w_bf, b_merged, noise2)

    probs = out[:, :E].astype(jnp.float32).reshape(B, T, E)
    idx = out[:, E:E + top_k].astype(jnp.int32).reshape(B, T, top_k)
    return probs, idx


def _reference(x, w_route, b_route, w_noise, b_noise, noise, top_k):
    # reference matches the kernel's bf16-input / f32-accumulate matmuls
    x_bf = x.astype(jnp.bfloat16)
    logits = jnp.dot(x_bf, w_route.astype(jnp.bfloat16),
                     preferred_element_type=jnp.float32) + b_route
    noise_logits = jnp.dot(x_bf, w_noise.astype(jnp.bfloat16),
                           preferred_element_type=jnp.float32) + b_noise
    noisy = logits + noise * jax.nn.softplus(noise_logits)
    _, idx = jax.lax.top_k(noisy, top_k)
    onehots = jax.nn.one_hot(idx, noisy.shape[-1], dtype=bool).any(axis=-2)
    sparse = jnp.where(onehots, noisy, -jnp.inf)
    probs = jax.nn.softmax(sparse, axis=-1)
    return probs, idx


if __name__ == "__main__":
    # config: n_embed=32, num_experts=8, top_k=2, bias=True
    B, T, D, E, TOP_K = 2, 8, 32, 8, 2

    key = jax.random.PRNGKey(0)
    kx, kwr, kbr, kwn, kbn, kn = jax.random.split(key, 6)

    x = jax.random.normal(kx, (B, T, D), dtype=jnp.float32)
    bound = 1.0 / (D ** 0.5)
    w_route = jax.random.uniform(kwr, (D, E), jnp.float32, -bound, bound)
    b_route = jax.random.uniform(kbr, (E,), jnp.float32, -bound, bound)
    w_noise = jax.random.uniform(kwn, (D, E), jnp.float32, -bound, bound)
    b_noise = jax.random.uniform(kbn, (E,), jnp.float32, -bound, bound)
    noise = jax.random.normal(kn, (B, T, E), dtype=jnp.float32)  # randn_like(logits)

    probs, idx = noisy_topk_router(
        x, w_route, b_route, w_noise, b_noise, noise, TOP_K)
    jax.block_until_ready((probs, idx))

    ref_probs, ref_idx = _reference(
        x, w_route, b_route, w_noise, b_noise, noise, TOP_K)
    # probs are stored bf16 in-kernel and the softmax divide uses the approx
    # EUP reciprocal, so compare with a bf16-level tolerance.
    assert jnp.allclose(probs, ref_probs, atol=1e-2, rtol=1e-2), (
        jnp.max(jnp.abs(probs - ref_probs)))
    assert jnp.array_equal(jnp.sort(idx, -1), jnp.sort(ref_idx, -1))

    print("KERNEL_OK")
</pallas_src>

<mosaic_0001>
module attributes {stable_mosaic.version = 11 : i64} {
  func.func @_router_kernel(%arg0: i32, %arg1: memref<8x32xf32, #tpu.memory_space<vmem>>, %arg2: memref<32x256xbf16, #tpu.memory_space<vmem>>, %arg3: memref<1x256xf32, #tpu.memory_space<vmem>>, %arg4: memref<8x8xf32, #tpu.memory_space<vmem>>, %arg5: memref<8x128xbf16, #tpu.memory_space<vmem>>) attributes {dimension_semantics = [#tpu.dimension_semantics<parallel>], iteration_bounds = array<i64: 2>, scalar_prefetch = 0 : i64, scratch_operands = 0 : i64, tpu.core_type = #tpu.core_type<tc>, window_params = [{transform_indices = @transform_0, window_bounds = array<i64: 8, 32>}, {pipeline_mode = #tpu.pipeline_mode<synchronous>, transform_indices = @transform_1, window_bounds = array<i64: 32, 256>}, {pipeline_mode = #tpu.pipeline_mode<synchronous>, transform_indices = @transform_2, window_bounds = array<i64: 1, 256>}, {transform_indices = @transform_3, window_bounds = array<i64: 8, 8>}, {transform_indices = @transform_4, window_bounds = array<i64: 8, 128>}]} {
    %c0 = arith.constant 0 : index
    %c0_0 = arith.constant 0 : index
    %0 = vector.load %arg1[%c0, %c0_0] : memref<8x32xf32, #tpu.memory_space<vmem>>, vector<8x32xf32>
    %1 = arith.truncf %0 : vector<8x32xf32> to vector<8x32xbf16>
    %c0_1 = arith.constant 0 : index
    %c0_2 = arith.constant 0 : index
    %2 = vector.load %arg2[%c0_1, %c0_2] : memref<32x256xbf16, #tpu.memory_space<vmem>>, vector<32x256xbf16>
    %cst = arith.constant dense<0.000000e+00> : vector<8x256xf32>
    %3 = tpu.matmul %1, %2, %cst {dimension_numbers = #tpu.dot_dimension_numbers<[1], [0], [0], [1], [0, 0, 1, 1], [], []>} : vector<8x32xbf16>, vector<32x256xbf16>, vector<8x256xf32> -> vector<8x256xf32>
    %c0_3 = arith.constant 0 : index
    %c0_4 = arith.constant 0 : index
    %4 = vector.load %arg3[%c0_3, %c0_4] : memref<1x256xf32, #tpu.memory_space<vmem>>, vector<1x256xf32>
    %5 = vector.broadcast %4 : vector<1x256xf32> to vector<8x256xf32>
    %6 = arith.addf %3, %5 : vector<8x256xf32>
    %7 = vector.extract_strided_slice %6 {offsets = [0, 0], sizes = [8, 128], strides = [1, 1]} : vector<8x256xf32> to vector<8x128xf32>
    %8 = vector.extract_strided_slice %6 {offsets = [0, 128], sizes = [8, 128], strides = [1, 1]} : vector<8x256xf32> to vector<8x128xf32>
    %cst_5 = arith.constant 0.000000e+00 : f32
    %9 = vector.broadcast %cst_5 : f32 to vector<8x128xf32>
    %10 = arith.maximumf %8, %9 : vector<8x128xf32>
    %11 = math.absf %8 : vector<8x128xf32>
    %cst_6 = arith.constant 0.000000e+00 : f32
    %12 = vector.broadcast %cst_6 : f32 to vector<8x128xf32>
    %13 = arith.subf %12, %11 : vector<8x128xf32>
    %14 = math.exp %13 : vector<8x128xf32>
    %15 = math.log1p %14 : vector<8x128xf32>
    %16 = arith.addf %10, %15 : vector<8x128xf32>
    %c0_7 = arith.constant 0 : index
    %c0_8 = arith.constant 0 : index
    %17 = vector.load %arg4[%c0_7, %c0_8] : memref<8x8xf32, #tpu.memory_space<vmem>>, vector<8x8xf32>
    %cst_9 = arith.constant 0.000000e+00 : f32
    %18 = vector.broadcast %cst_9 : f32 to vector<8x120xf32>
    %19 = tpu.concatenate %17, %18 in 1 : vector<8x8xf32>, vector<8x120xf32> -> vector<8x128xf32>
    %20 = arith.mulf %19, %16 : vector<8x128xf32>
    %21 = arith.addf %7, %20 : vector<8x128xf32>
    %22 = tpu.iota {dimensions = array<i32: 1>} : vector<8x128xi32>
    %cst_10 = arith.constant 0.000000e+00 : f32
    %23 = vector.broadcast %cst_10 : f32 to vector<8x128xf32>
    %cst_11 = arith.constant 0.000000e+00 : f32
    %24 = vector.broadcast %cst_11 : f32 to vector<8x1xf32>
    %cst_12 = arith.constant dense<0xFF800000> : vector<8xf32>
    %25 = vector.multi_reduction <maximumf>, %21, %cst_12 [1] : vector<8x128xf32> to vector<8xf32>
    %26 = vector.shape_cast %25 : vector<8xf32> to vector<8x1xf32>
    %cst_13 = arith.constant 1.000000e+00 : f32
    %27 = vector.broadcast %cst_13 : f32 to vector<8x1xf32>
    %28 = vector.broadcast %26 : vector<8x1xf32> to vector<8x128xf32>
    %29 = arith.cmpf oeq, %21, %28 : vector<8x128xf32>
    %c128_i32 = arith.constant 128 : i32
    %30 = vector.broadcast %c128_i32 : i32 to vector<8x128xi32>
    %31 = arith.select %29, %22, %30 : vector<8x128xi1>, vector<8x128xi32>
    %cst_14 = arith.constant dense<2147483647> : vector<8xi32>
    %32 = vector.multi_reduction <minsi>, %31, %cst_14 [1] : vector<8x128xi32> to vector<8xi32>
    %33 = vector.shape_cast %32 : vector<8xi32> to vector<8x1xi32>
    %34 = vector.broadcast %33 : vector<8x1xi32> to vector<8x128xi32>
    %35 = arith.cmpi eq, %22, %34 : vector<8x128xi32>
    %cst_15 = arith.constant 0.000000e+00 : f32
    %36 = vector.shape_cast %27 : vector<8x1xf32> to vector<8x1xf32>
    %37 = vector.broadcast %36 : vector<8x1xf32> to vector<8x128xf32>
    %38 = vector.broadcast %cst_15 : f32 to vector<8x128xf32>
    %39 = arith.select %35, %37, %38 : vector<8x128xi1>, vector<8x128xf32>
    %40 = arith.addf %23, %39 : vector<8x128xf32>
    %41 = arith.addf %24, %27 : vector<8x1xf32>
    %cst_16 = arith.constant 0xFF800000 : f32
    %42 = vector.broadcast %cst_16 : f32 to vector<8x128xf32>
    %43 = arith.select %35, %42, %21 : vector<8x128xi1>, vector<8x128xf32>
    %cst_17 = arith.constant dense<0xFF800000> : vector<8xf32>
    %44 = vector.multi_reduction <maximumf>, %43, %cst_17 [1] : vector<8x128xf32> to vector<8xf32>
    %45 = vector.shape_cast %44 : vector<8xf32> to vector<8x1xf32>
    %46 = arith.subf %45, %26 : vector<8x1xf32>
    %47 = math.exp %46 : vector<8x1xf32>
    %48 = vector.broadcast %45 : vector<8x1xf32> to vector<8x128xf32>
    %49 = arith.cmpf oeq, %43, %48 : vector<8x128xf32>
    %c128_i32_18 = arith.constant 128 : i32
    %50 = vector.broadcast %c128_i32_18 : i32 to vector<8x128xi32>
    %51 = arith.select %49, %22, %50 : vector<8x128xi1>, vector<8x128xi32>
    %cst_19 = arith.constant dense<2147483647> : vector<8xi32>
    %52 = vector.multi_reduction <minsi>, %51, %cst_19 [1] : vector<8x128xi32> to vector<8xi32>
    %53 = vector.shape_cast %52 : vector<8xi32> to vector<8x1xi32>
    %54 = vector.broadcast %53 : vector<8x1xi32> to vector<8x128xi32>
    %55 = arith.cmpi eq, %22, %54 : vector<8x128xi32>
    %cst_20 = arith.constant 0.000000e+00 : f32
    %56 = vector.shape_cast %47 : vector<8x1xf32> to vector<8x1xf32>
    %57 = vector.broadcast %56 : vector<8x1xf32> to vector<8x128xf32>
    %58 = vector.broadcast %cst_20 : f32 to vector<8x128xf32>
    %59 = arith.select %55, %57, %58 : vector<8x128xi1>, vector<8x128xf32>
    %60 = arith.addf %40, %59 : vector<8x128xf32>
    %61 = arith.addf %41, %47 : vector<8x1xf32>
    %62 = tpu.reciprocal %61 {approx = true} : vector<8x1xf32> -> vector<8x1xf32>
    %63 = vector.broadcast %62 : vector<8x1xf32> to vector<8x128xf32>
    %64 = arith.mulf %60, %63 : vector<8x128xf32>
    %c8_i32 = arith.constant 8 : i32
    %65 = vector.broadcast %c8_i32 : i32 to vector<8x128xi32>
    %66 = arith.cmpi eq, %22, %65 : vector<8x128xi32>
    %67 = arith.sitofp %33 : vector<8x1xi32> to vector<8x1xf32>
    %68 = vector.shape_cast %67 : vector<8x1xf32> to vector<8x1xf32>
    %69 = vector.broadcast %68 : vector<8x1xf32> to vector<8x128xf32>
    %70 = arith.select %66, %69, %64 : vector<8x128xi1>, vector<8x128xf32>
    %c9_i32 = arith.constant 9 : i32
    %71 = vector.broadcast %c9_i32 : i32 to vector<8x128xi32>
    %72 = arith.cmpi eq, %22, %71 : vector<8x128xi32>
    %73 = arith.sitofp %53 : vector<8x1xi32> to vector<8x1xf32>
    %74 = vector.shape_cast %73 : vector<8x1xf32> to vector<8x1xf32>
    %75 = vector.broadcast %74 : vector<8x1xf32> to vector<8x128xf32>
    %76 = arith.select %72, %75, %70 : vector<8x128xi1>, vector<8x128xf32>
    %77 = arith.truncf %76 : vector<8x128xf32> to vector<8x128xbf16>
    %c0_21 = arith.constant 0 : index
    %c0_22 = arith.constant 0 : index
    %78 = vector.load %arg5[%c0_21, %c0_22] : memref<8x128xbf16, #tpu.memory_space<vmem>>, vector<8x128xbf16>
    tpu.vector_store %arg5[%c0_21, %c0_22], %77 {strides = array<i32>} : memref<8x128xbf16, #tpu.memory_space<vmem>>, vector<8x128xbf16>,
    return
  }
  func.func @transform_0(%arg0: i32) -> (i32, i32) {
    %c0_i32 = arith.constant 0 : i32
    %c0_i32_0 = arith.constant 0 : i32
    return %arg0, %c0_i32 : i32, i32
  }
  func.func @transform_1(%arg0: i32) -> (i32, i32) {
    %c0_i32 = arith.constant 0 : i32
    %c0_i32_0 = arith.constant 0 : i32
    %c0_i32_1 = arith.constant 0 : i32
    return %c0_i32, %c0_i32_0 : i32, i32
  }
  func.func @transform_2(%arg0: i32) -> (i32, i32) {
    %c0_i32 = arith.constant 0 : i32
    %c0_i32_0 = arith.constant 0 : i32
    %c0_i32_1 = arith.constant 0 : i32
    return %c0_i32, %c0_i32_0 : i32, i32
  }
  func.func @transform_3(%arg0: i32) -> (i32, i32) {
    %c0_i32 = arith.constant 0 : i32
    %c0_i32_0 = arith.constant 0 : i32
    return %arg0, %c0_i32 : i32, i32
  }
  func.func @transform_4(%arg0: i32) -> (i32, i32) {
    %c0_i32 = arith.constant 0 : i32
    %c0_i32_0 = arith.constant 0 : i32
    return %arg0, %c0_i32 : i32, i32
  }
}

</mosaic_0001>

<bundles_post_ra>
// kernel: tpu_custom_call.1
= control target key start
LH: loop header
LB: loop body
LE: loop exit
PB: predicated region body
PF: predicated region fallthrough
CT: control target
= control target key end

     0   :  { %9 = vsyncpa [#allocation3], 0  ;;  %s858_s0 = inlined_call_operand.vmem [shape: f32[16,32], index: 0, kind: input, shape index: {}]   ;;  %s859_s1 = inlined_call_operand.hbm [shape: bf16[32,256], index: 1, kind: input, shape index: {}]   ;;  %s860_s2 = inlined_call_operand.vmem [shape: f32[1,256], index: 2, kind: input, shape index: {}]   ;;  %s861_s3 = inlined_call_operand.vmem [shape: f32[16,8], index: 3, kind: input, shape index: {}]   ;;  %s862_s4 = inlined_call_operand.hbm [shape: bf16[16,128], index: 4, kind: output, shape index: {}]  }
   0x1   :  { %10 = vsyncpa [#allocation4], 0 }
   0x2   :  { %12 = vsyncpa [#allocation4 + $0x1], 0  ;;  %s698_s15 = smov 0   ;;  %s700_s16 = smov 0  }
   0x3   :  { %s702_s17 = smov 0   ;;  %s704_s18 = smov 0  }
   0x4 LB: > { %s719_s19 = sadd.s32 4294967295, %s665_s18   ;;  %s485_s20 = sadd.s32 4294967294, %s665_s18   ;;  %s665_s18 = sphi %s704_s18, %s878_s18   ;;  %s661_s17 = sphi %s702_s17, %s877_s17   ;;  %s657_s16 = sphi %s700_s16, %s876_s16   ;;  %s653_s15 = sphi %s698_s15, %s875_s15  }
   0x5   : > { %s723_s21 = sadd.s32 1, %s665_s18   ;;  %s119_s22 = sadd.s32 1, %s661_s17 }
   0x6   : > { %s116_s23 = ssub.s32 %s665_s18, %s723_s21  ;;  %p129_p0 = scmp.ne.s32.totalorder %s661_s17, %s657_s16 }
   0x7   : > { %p117_p1 = scmp.eq.s32.totalorder %s116_s23, 0  ;;  %p130_p2 = scmp.eq.s32.totalorder %s719_s19, 1 }
   0x8   : > { %p135_p3 = scmp.ne.s32.totalorder %s657_s16, %s653_s15  ;;  %p136_p4 = scmp.eq.s32.totalorder %s485_s20, 1 }
   0x9   : > { %s734_s24 = scalar_select %p117_p1, %s661_s17, %s119_s22  }
   0xa   : > { %p736_p5 = por %p130_p2, %p129_p0  ;;  %p740_p6 = por %p136_p4, %p135_p3 }
   0xb   : > { %p486_p7 = scmp.ge.s32.totalorder %s665_s18, 1  ;;  %p143_p8 = scmp.lt.s32.totalorder %s665_s18, 3 }
   0xc   : > { %s866_s25 = scalar_select %p736_p5, 1, 0 }
   0xd   : > { %s867_s26 = scalar_select %p740_p6, 1, 0 }
   0xe   : > { %p863_p9 = scmp.eq.s32.totalorder %s719_s19, 0  ;;  %p747_p10 = pnand %p486_p7, %p143_p8 }
   0xf   : > { %s667_s28 = smov [#allocation2]   ;;  %s571_s7 = scalar_lea.hbm %s859_s1, 512 }
  0x10   : > { %s868_s27 = scalar_select %p747_p10, 1, 0 }
  0x11   : > { %s155_s29 = sshll.u32 %s667_s28, 4  ;;  %p509_p11 = pneg %p747_p10  ;;  %s156_s29 = int_to_ptr.vmem [resolvable:$true] %s155_s29 }
  0x12   : > { %p572_p13 = scmp.ne.s32.totalorder %s859_s1, %s571_s7  ;;  %p578_p3 = scmp.lt.u32.totalorder %s571_s7, %s859_s1 }
  0x13   : > { %p755_p12 = pnand %p863_p9, %p509_p11 }
  0x15   : > { %p573_p0 = pneg %p755_p12 }
  0x17   : > { %p574_p1 = pnand %p573_p0, %p572_p13 }
  0x19   : > { %p575_p2 = pneg %p574_p1 }
  0x1b   : > { %p580_p4 = pnand %p578_p3, %p575_p2 }
  0x1d   : > { %583 = shalt.err (!%p580_p4)
}
  0x1e   : > { %s584_s12 = scalar_lea.vmem %s156_s29, 512  ;;  %p592_p9 = scmp.lt.s32.totalorder %s156_s29, %s156_s29 }
  0x1f   : > { %p585_p7 = scmp.ne.s32.totalorder %s156_s29, %s584_s12  ;;  %p593_p6 = scmp.lt.s32.totalorder %s584_s12, %s584_s12 }
  0x21   : > { %p587_p8 = pnand %p585_p7, %p573_p0  ;;  %p594_p5 = por %p593_p6, %p592_p9 }
  0x23   : > { %p588_p11 = pneg %p587_p8 }
  0x25   : > { %p595_p10 = pnand %p594_p5, %p588_p11 }
  0x27   : > { %598 = shalt.err (!%p595_p10)
}
  0x28   : > { %s668_s13 = smov 128   ;;  %s669_s14 = smov 8  }
  0x29   : > { %512 = dma.hbm_to_vmem [thread:$0]  (!%p755_p12), %s859_s1, 512, %s156_s29, [#allocation3], %s668_s13, %s668_s13, %s669_s14  }
  0x2a   : > { %p870_p13 = scmp.ne.s32.totalorder %s868_s27, 0 }
  0x2b   : > { %p871_p1 = scmp.eq.s32.totalorder (!%p870_p13), %s719_s19, 0 }
  0x2c   : > { %188 = sbr.rel (%p870_p13) target bundleno = 1217 (0x4c1), region = 36 }
  0x33   : > { %644 = dma.done.wait (%p871_p1), [#allocation3], 512   ;;  %p872_p0 = pmov %p871_p1 }
  0x34   : > { %p217_p5 = scmp.lt.s32.totalorder %s719_s19, 1  ;;  %v670_v0 = vmov 0   ;;  %v557_v1 = vld [vmem:[#allocation2 + $0x4] ss:$8 sps:$4 sm:$0xff]   ;;  %v559_v2 = vld [vmem:[#allocation2] ss:$8 sps:$4 sm:$0xff]   ;;  %v234_v7 = vlaneseq }
  0x35   : > { %646 = vsyncadd (%p872_p0), [#allocation3], 4294966784  ;;  %300 = vmatprep.mubr.bf16.mxu0 %v670_v0  ;;  %268 = vmatprep.subr.bf16.mxu0 %v557_v1  ;;  %v560_v3 = vld [vmem:[#allocation2 + $0x14] ss:$8 sps:$4 sm:$0xff]   ;;  %v562_v4 = vld [vmem:[#allocation2 + $0x10] ss:$8 sps:$4 sm:$0xff]  }
  0x36   : > { %s783_s23 = scalar_select %p217_p5, %s719_s19, 1  ;;  %269 = vmatpush1.bf16.msra.mxu0 %v559_v2  ;;  %vm264_vm0 = vcmask 261120   ;;  %v235_v8 = vshrl.u32 %v234_v7, 7  ;;  %v232_v10 = vld [vmem:[%s860_s2] sm:$0x3]  ;;  %vm325_vm1 = vcmask 64512  }
  0x37   : > { %270 = vmatprep.subr.bf16.mxu0 %v560_v3  ;;  %v799_v38 = vand.u32 127, %v234_v7  ;;  %s214_s10 = sand.u32 1, %s657_s16   ;;  %s500_s12 = sshll.u32 %s719_s19, 6 }
  0x38   : > { %s492_s28 = sshll.u32 %s783_s23, 3  ;;  %v240_v9 = vsub.s32 1, %v235_v8  ;;  %v236_v24 = vsub.s32 0, %v235_v8  ;;  %s491_s11 = sshll.u32 %s214_s10, 2 }
  0x39   : > { %s220_s30 = scalar_lea.vmem %s858_s0, %s492_s28  ;;  %s224_s9 = scalar_lea.vmem %s861_s3, %s492_s28  ;;  %vm380_vm9 = vcmp.eq.s32.totalorder %v799_v38, 8  ;;  %vm383_vm10 = vcmp.eq.s32.totalorder %v799_v38, 9 }
  0x3a   : > { %v226_v5 = vld [vmem:[%s220_s30] sm:$0xff]  ;;  %271 = vmatpush1.bf16.msra.mxu0 %v562_v4  ;;  %v241_v11 = vrot.slane %v232_v10, %v240_v9  ;;  %v237_v30 = vrot.slane %v232_v10, %v236_v24  ;;  %s216_s13 = scalar_lea.vmem [#allocation5], %s491_s11  ;;  %s816_s23 = scalar_lea.hbm %s862_s4, %s500_s12 }
  0x3b   : > { %v227_v6 = vpack.c.bf16 %v226_v5, %v226_v5  ;;  %v324_v27 = vld [vmem:[%s224_s9] sm:$0xff]  ;;  %s402_s14 = sshll.u32 %s216_s13, 4  ;;  %s389_s28 = scalar_lea.sflag [#allocation4], %s214_s10  ;;  %s818_s14 = int_to_ptr.vmem [resolvable:$true] %s402_s14 }
  0x3c   : > { %v326_v33 = vsel %vm325_vm1, %v324_v27, 0.0  ;;  %s599_s27 = scalar_lea.vmem %s818_s14, 64  ;;  %p873_p9 = scmp.ne.s32.totalorder %s866_s25, 0 }
  0x3d   : > { %498 = vmatmul.mubr.msk.bf16.vlgmr.msra.gmra.mrb[0].mxu0 %vm264_vm0, %v227_v6  ;;  %v671_v6 = vmov 0.0   ;;  %p600_p6 = scmp.ne.s32.totalorder %s818_s14, %s599_s27  ;;  %s672_s19 = smov [#allocation5]  }
  0x3e   : > { %s603_s29 = sshll.u32 %s672_s19, 4  ;;  %s604_s29 = int_to_ptr.vmem [resolvable:$false] %s603_s29 }
  0x3f   : > { %p601_p10 = pnand %p600_p6, %p873_p9  ;;  %s605_s30 = scalar_lea.vmem %s604_s29, 128 }
  0x40   : > { %p606_p2 = scmp.lt.s32.totalorder %s818_s14, %s604_s29  ;;  %p607_p3 = scmp.lt.s32.totalorder %s605_s30, %s599_s27 }
  0x41   : > { %p602_p12 = pneg %p601_p10 }
  0x42   : > { %p608_p4 = por %p607_p3, %p606_p2 }
  0x44   : > { %p609_p7 = pnand %p608_p4, %p602_p12 }
 0x110   : > { %v302_v12 = vpop.f32.mrb[0].mxu0 }
 0x111   : > { %v304_v13 = vpop.f32.mrb[1].mxu0  ;;  %v303_v35 = vadd.f32 %v302_v12, %v237_v30 }
 0x112   : > { %v305_v14 = vadd.f32 %v304_v13, %v241_v11  ;;  %v306_v15 = vpop.f32.mrb[2].mxu0 }
 0x113   : > { %v307_v16 = vpop.f32.mrb[3].mxu0 }
 0x114   : > { %v310_v17 = vand.u32 2147483647, %v305_v14  ;;  %v309_v31 = vmax.f32 %v305_v14, 0.0 }
 0x116   : > { %v311_v18 = vsub.f32 0.0, %v310_v17 }
 0x118   : > { %v312_v19 = vmul.f32 1.442695, %v311_v18 }
 0x11a   : > { %563 = vpow2.f32 %v312_v19 }
 0x124   : > { %v564_v20 = vpop.eup %563 }
 0x125   : > { %v314_v21 = vadd.f32 1.0, %v564_v20  ;;  %v317_v22 = vmul.f32 -0.5, %v564_v20  ;;  %v320_v25 = vand.u32 2147483647, %v564_v20 }
 0x127   : > { %565 = vlog2.f32 %v314_v21  ;;  %v318_v23 = vadd.f32 1.0, %v317_v22  ;;  %vm321_vm2 = vcmp.lt.f32.partialorder %v320_v25, 0.0004427343 }
 0x129   : > { %v319_v29 = vmul.f32 %v564_v20, %v318_v23 }
 0x131   : > { %v566_v26 = vpop.eup %565 }
 0x132   : > { %v316_v28 = vmul.f32 0.6931472, %v566_v26 }
 0x134   : > { %v322_v32 = vsel %vm321_vm2, %v319_v29, %v316_v28 }
 0x135   : > { %v323_v34 = vadd.f32 %v322_v32, %v309_v31 }
 0x137   : > { %v327_v36 = vmul.f32 %v326_v33, %v323_v34 }
 0x139   : > { %v328_v37 = vadd.f32 %v327_v36, %v303_v35 }
 0x13b   : > { %331 = vmax.xlane.f32.xlu0 %v328_v37 }
 0x1c8   : > { %v332_v39 = vpop.xlane.xlu0 %331 }
 0x1c9   : > { %vm333_vm3 = vcmp.eq.f32.partialorder %v328_v37, %v332_v39 }
 0x1ca   : > { %v334_v40 = vsel %vm333_vm3, %v799_v38, 128 }
 0x1cb   : > { %v336_v41 = vshra.s32 %v334_v40, 16  ;;  %v335_v43 = vand.u32 65535, %v334_v40 }
 0x1cd   : > { %v338_v42 = vcvt.s32.f32 %v336_v41  ;;  %v337_v45 = vcvt.s32.f32 %v335_v43 }
 0x1cf   : > { %339 = vmin.xlane.f32.xlu0 %v338_v42 }
 0x25c   : > { %v340_v44 = vpop.xlane.xlu0 %339 }
 0x25d   : > { %vm341_vm4 = vcmp.eq.f32.partialorder %v338_v42, %v340_v44  ;;  %v346_v47 = vcvt.f32.s32 %v340_v44 }
 0x25e   : > { %v342_v46 = vsel %vm341_vm4, %v337_v45, inf }
 0x25f   : > { %343 = vmin.xlane.f32.xlu1 %v342_v46  ;;  %v347_v49 = vshll.u32 %v346_v47, 16 }
 0x2ec   : > { %v344_v48 = vpop.xlane.xlu1 %343 }
 0x2ed   : > { %v345_v50 = vcvt.f32.s32 %v344_v48 }
 0x2ef   : > { %v348_v51 = vadd.s32 %v347_v49, %v345_v50 }
 0x2f1   : > { %vm349_vm5 = vcmp.eq.s32.totalorder %v799_v38, %v348_v51  ;;  %v381_v11 = vcvt.s32.f32 %v348_v51 }
 0x2f2   : > { %v352_v52 = vsel %vm349_vm5, -inf, %v328_v37  ;;  %v350_v7 = vsel %vm349_vm5, 1.0, %v671_v6 }
 0x2f3   : > { %353 = vmax.xlane.f32.xlu1 %v352_v52 }
 0x380   : > { %v354_v53 = vpop.xlane.xlu1 %353 }
 0x381   : > { %vm358_vm6 = vcmp.eq.f32.partialorder %v352_v52, %v354_v53  ;;  %v355_v61 = vsub.f32 %v354_v53, %v332_v39 }
 0x382   : > { %v359_v54 = vsel %vm358_vm6, %v799_v38, 128 }
 0x383   : > { %v361_v55 = vshra.s32 %v359_v54, 16  ;;  %v360_v57 = vand.u32 65535, %v359_v54  ;;  %v356_v62 = vmul.f32 1.442695, %v355_v61 }
 0x385   : > { %v363_v56 = vcvt.s32.f32 %v361_v55  ;;  %v362_v59 = vcvt.s32.f32 %v360_v57  ;;  %567 = vpow2.f32 %v356_v62 }
 0x387   : > { %364 = vmin.xlane.f32.xlu0 %v363_v56 }
 0x38f   : > { %v568_v63 = vpop.eup %567 }
 0x390   : > { %v377_v0 = vadd.f32 1.0, %v568_v63 }
 0x392   : > { %569 = vrcp.f32 %v377_v0 }
 0x39c   : > { %v570_v10 = vpop.eup %569 }
 0x414   : > { %v365_v58 = vpop.xlane.xlu0 %364 }
 0x415   : > { %vm366_vm7 = vcmp.eq.f32.partialorder %v363_v56, %v365_v58  ;;  %v371_v1 = vcvt.f32.s32 %v365_v58 }
 0x416   : > { %v367_v60 = vsel %vm366_vm7, %v362_v59, inf }
 0x417   : > { %368 = vmin.xlane.f32.xlu1 %v367_v60  ;;  %v372_v3 = vshll.u32 %v371_v1, 16 }
 0x4a4   : > { %v369_v2 = vpop.xlane.xlu1 %368 }
 0x4a5   : > { %v370_v4 = vcvt.f32.s32 %v369_v2 }
 0x4a7   : > { %v373_v5 = vadd.s32 %v372_v3, %v370_v4 }
 0x4a9   : > { %vm374_vm8 = vcmp.eq.s32.totalorder %v799_v38, %v373_v5  ;;  %v384_v13 = vcvt.s32.f32 %v373_v5 }
 0x4aa   : > { %v375_v8 = vsel %vm374_vm8, %v568_v63, 0.0 }
 0x4ab   : > { %v376_v9 = vadd.f32 %v375_v8, %v350_v7 }
 0x4ad   : > { %v379_v12 = vmul.f32 %v570_v10, %v376_v9 }
 0x4af   : > { %v382_v14 = vsel %vm380_vm9, %v381_v11, %v379_v12 }
 0x4b0   : > { %v385_v15 = vsel %vm383_vm10, %v384_v13, %v382_v14 }
 0x4b1   : > { %v386_v16 = vpack.c.bf16 %v385_v15, %v385_v15 }
 0x4b3   : > { %387 = vst [vmem:[%s216_s13] sm:$0xf] %v386_v16 }
 0x4b4   : > { %612 = shalt.err (!%p609_p7)
}
 0x4b5   : > { %s613_s5 = scalar_lea.hbm %s816_s23, 64  ;;  %s617_s8 = scalar_lea.hbm %s862_s4, 128 }
 0x4b6   : > { %p614_p8 = scmp.ne.s32.totalorder %s816_s23, %s613_s5  ;;  %p618_p1 = scmp.lt.u32.totalorder %s816_s23, %s862_s4 }
 0x4b7   : > { %p619_p0 = scmp.lt.u32.totalorder %s617_s8, %s613_s5  ;;  %p621_p6 = scmp.lt.u32.totalorder %s613_s5, %s816_s23 }
 0x4b8   : > { %p615_p11 = pnand %p614_p8, %p873_p9 }
 0x4b9   : > { %p620_p5 = por %p619_p0, %p618_p1 }
 0x4ba   : > { %p616_p13 = pneg %p615_p11 }
 0x4bb   : > { %p622_p10 = por %p621_p6, %p620_p5 }
 0x4bd   : > { %p623_p12 = pnand %p622_p10, %p616_p13 }
 0x4bf   : > { %626 = shalt.err (!%p623_p12)
}
 0x4c0   : > { %507 = dma.vmem_to_hbm [thread:$0]  (%p873_p9), %s818_s14, 64, %s816_s23, %s389_s28  }
 0x4c1 PF: > { %p519_p2 = scmp.ge.s32.totalorder %s665_s18, 2  ;;  %s414_s11 = sand.u32 1, %s653_s15  }
 0x4c2   : > { %p874_p3 = scmp.ne.s32.totalorder %s867_s26, 0  ;;  %s415_s12 = scalar_lea.sflag [#allocation4], %s414_s11 }
 0x4c4   : > { %p514_p4 = pnand %p519_p2, %p874_p3 }
 0x4c6   : > { %648 = dma.done.wait (!%p514_p4), %s415_s12, 64  }
 0x4c7   : > { %650 = vsyncadd (!%p514_p4), %s415_s12, 4294967232  ;;  %p15_p7 = scmp.ge.s32.totalorder %s723_s21, 4   ;;  %s875_s15 = smov %s657_s16 }
 0x4c8   : > { %s876_s16 = smov %s661_s17  ;;  %s877_s17 = smov %s734_s24 }
 0x4c9   : > { %s878_s18 = smov %s723_s21  ;;  %17 = sbr.rel (!%p15_p7) target bundleno = 4 (0x4), region = 79 }
 0x4d0   :  { %420 = vsyncpa [#allocation3], 1 }
 0x4d1   :  { %422 = vsyncpa [#allocation3 + $0x1], 1 }
 0x4d2   :  { %423 = vsyncpa [#allocation4], 1 }
 0x4d3   :  { %425 = vsyncpa [#allocation4 + $0x1], 1 }

</bundles_post_ra>
